<compile_context>
chip_gen: v6e
topology: v6e:2x2x1
jax: 0.10.0
libtpu: 0.0.40
codegen_flags: <defaults>
</compile_context>

<pallas_src>
import functools
import numpy as np
import jax
import jax.numpy as jnp
from jax import lax
from jax.experimental import pallas as pl
from jax.experimental.pallas import tpu as pltpu


# ----------------------------------------------------------------------------
# generation-aware VMEM sizing
# ----------------------------------------------------------------------------
def _tpu_vmem_capacity_bytes():
    try:
        return int(pltpu.get_tpu_info().vmem_capacity_bytes)
    except Exception:
        return 64 << 20  # conservative (v7x per-TC)


_VMEM_CAP = _tpu_vmem_capacity_bytes()
VMEM_LIMIT = min((_VMEM_CAP * 3) // 4, 100 << 20)      # 48 MB on v7x, ~96 MB on v5e/v6e
MAX_ROW_TILE = 512 if _VMEM_CAP >= (96 << 20) else 256


# ----------------------------------------------------------------------------
# helpers
# ----------------------------------------------------------------------------
def _round_up(x, m):
    return ((x + m - 1) // m) * m


def _pick_row_tile(n, max_tile):
    """Largest multiple-of-8 divisor of n that is <= max_tile (or n itself)."""
    max_tile = max(8, min(max_tile, n))
    if n <= max_tile:
        return n
    for cand in range(max_tile - max_tile % 8, 7, -8):
        if n % cand == 0:
            return cand
    return n  # no clean divisor -> full extent (always layout-legal)


def _pick_time_chunk(T, B, H, budget_bytes):
    """Largest divisor of T whose DOUBLE-BUFFERED bf16 chunk fits the budget."""
    # per timestep: gx fwd+bwd (2 * 4H bf16) in, y fwd+bwd (2 * H bf16) out, x2 dbuf
    per_t = 2 * (2 * B * 4 * H * 2 + 2 * B * H * 2)
    max_chunk = max(1, budget_bytes // per_t)
    best = 1
    for cand in range(1, T + 1):
        if cand <= max_chunk and T % cand == 0:
            best = cand
    return best


def _sigmoid(x):
    # single EUP transcendental per gate (instead of exp + divide)
    return 0.5 * (jnp.tanh(0.5 * x) + 1.0)


# ----------------------------------------------------------------------------
# Kernel 1: fused row-tiled matmul (used for the input projection and the
#   classifier).  out = [tanh](x_0) @ w[0] + ... + [tanh](x_{K-1}) @ w[K-1] + b
# ----------------------------------------------------------------------------
def _fused_mm_kernel(*refs, n_in, apply_tanh):
    x_refs = refs[:n_in]
    w_ref, b_ref, o_ref = refs[n_in], refs[n_in + 1], refs[n_in + 2]
    acc = jnp.zeros(o_ref.shape, jnp.float32) + b_ref[...]
    for k in range(n_in):
        xk = x_refs[k][...]
        if apply_tanh:
            xk = jnp.tanh(xk.astype(jnp.float32)).astype(jnp.bfloat16)
        acc = acc + jnp.dot(xk, w_ref[k], preferred_element_type=jnp.float32)
    o_ref[...] = acc.astype(o_ref.dtype)


def fused_matmul(xs, w, b, *, apply_tanh, out_dtype):
    """xs: list of [N, Dk] bf16; w: [K, Dk, Gout] bf16; b: [1, Gout] f32."""
    n = xs[0].shape[0]
    n_in, dk, gout = w.shape
    assert len(xs) == n_in
    out_bytes = jnp.dtype(out_dtype).itemsize
    w_bytes = 2 * int(w.size) * 2                         # bf16, double-buffered
    per_row = 2 * (n_in * dk * 2 + gout * out_bytes)      # dbuf'd x tiles + out tile
    tile_cap = max(8, (VMEM_LIMIT - w_bytes - (4 << 20)) // max(per_row, 1))
    tile_n = _pick_row_tile(n, min(MAX_ROW_TILE, tile_cap))

    kernel = functools.partial(_fused_mm_kernel, n_in=n_in, apply_tanh=apply_tanh)
    in_specs = [pl.BlockSpec((tile_n, dk), lambda i: (i, 0)) for _ in range(n_in)]
    in_specs.append(pl.BlockSpec((n_in, dk, gout), lambda i: (0, 0, 0)))
    in_specs.append(pl.BlockSpec((1, gout), lambda i: (0, 0)))
    return pl.pallas_call(
        kernel,
        out_shape=jax.ShapeDtypeStruct((n, gout), out_dtype),
        grid=(n // tile_n,),
        in_specs=in_specs,
        out_specs=pl.BlockSpec((tile_n, gout), lambda i: (i, 0)),
        compiler_params=pltpu.CompilerParams(
            dimension_semantics=("parallel",),
            vmem_limit_bytes=VMEM_LIMIT),
    )(*xs, w, b)


# ----------------------------------------------------------------------------
# Kernel 2: bidirectional LSTM recurrence, both directions interleaved in one
#   kernel.  Only h @ W_hh remains inside the time loop (x @ W_ih was hoisted
#   into Kernel 1).  grid = (time chunks,) ["arbitrary"]; h/c for both chains
#   live in VMEM scratch across chunks.  The backward chain walks chunks (and
#   the in-chunk loop) in reverse purely via index arithmetic — no HBM reversal.
# ----------------------------------------------------------------------------
def _bilstm_kernel(gxf_ref, gxb_ref, whh_ref, yf_ref, yb_ref,
                   hf, cf, hb, cb, *, T_CHUNK, H):
    @pl.when(pl.program_id(0) == 0)
    def _():
        hf[...] = jnp.zeros_like(hf)
        cf[...] = jnp.zeros_like(cf)
        hb[...] = jnp.zeros_like(hb)
        cb[...] = jnp.zeros_like(cb)

    def cell(gates, c_prev):
        i = _sigmoid(gates[:, 0:H])
        f = _sigmoid(gates[:, H:2 * H])
        g = jnp.tanh(gates[:, 2 * H:3 * H])
        o = _sigmoid(gates[:, 3 * H:4 * H])
        c = f * c_prev + i * g
        h = o * jnp.tanh(c)
        return h, c

    def step(t, carry):
        tf = t                       # forward local time index
        tb = T_CHUNK - 1 - t         # backward local time index
        gf = gxf_ref[tf].astype(jnp.float32) + jnp.dot(
            hf[...].astype(jnp.bfloat16), whh_ref[0],
            preferred_element_type=jnp.float32)
        gb = gxb_ref[tb].astype(jnp.float32) + jnp.dot(
            hb[...].astype(jnp.bfloat16), whh_ref[1],
            preferred_element_type=jnp.float32)
        h_f, c_f = cell(gf, cf[...])
        h_b, c_b = cell(gb, cb[...])
        hf[...] = h_f
        cf[...] = c_f
        hb[...] = h_b
        cb[...] = c_b
        yf_ref[tf] = h_f.astype(yf_ref.dtype)
        yb_ref[tb] = h_b.astype(yb_ref.dtype)
        return carry

    lax.fori_loop(0, T_CHUNK, step, 0, unroll=2)


def bilstm_layer(gates_x, w_hh, hidden_size, t_chunk):
    """gates_x: [T, B, 8H] bf16 (fwd gates | bwd gates); w_hh: [2, H, 4H] bf16.
    Returns (y_fwd, y_bwd), each [T, B, H] bf16."""
    T, B, _ = gates_x.shape
    H = hidden_size
    G = 4 * H
    n_tc = T // t_chunk
    kernel = functools.partial(_bilstm_kernel, T_CHUNK=t_chunk, H=H)
    return pl.pallas_call(
        kernel,
        out_shape=(jax.ShapeDtypeStruct((T, B, H), jnp.bfloat16),
                   jax.ShapeDtypeStruct((T, B, H), jnp.bfloat16)),
        grid=(n_tc,),
        in_specs=[
            # forward gates: chunk tc, first 4H lanes
            pl.BlockSpec((t_chunk, B, G), lambda tc: (tc, 0, 0)),
            # backward gates: reversed chunk order, last 4H lanes
            pl.BlockSpec((t_chunk, B, G), lambda tc: (n_tc - 1 - tc, 0, 1)),
            pl.BlockSpec((2, H, G), lambda tc: (0, 0, 0)),
        ],
        out_specs=[
            pl.BlockSpec((t_chunk, B, H), lambda tc: (tc, 0, 0)),
            pl.BlockSpec((t_chunk, B, H), lambda tc: (n_tc - 1 - tc, 0, 0)),
        ],
        scratch_shapes=[pltpu.VMEM((B, H), jnp.float32)] * 4,  # hf, cf, hb, cb
        compiler_params=pltpu.CompilerParams(
            dimension_semantics=("arbitrary",),
            vmem_limit_bytes=VMEM_LIMIT),
    )(gates_x, gates_x, w_hh)


# ----------------------------------------------------------------------------
# Full forward (glue in plain JAX; one bf16 transpose in, one tiny one out)
# ----------------------------------------------------------------------------
def ner_forward(hidden, params, hidden_dim, num_labels):
    """hidden: [B, T, H] f32 (LM output). Returns cls_logits [B, T, num_labels]."""
    B, T, D = hidden.shape
    H = hidden_dim
    assert D == H, "LSTM input_size == hidden_dim per the module definition"
    N = T * B

    # recurrence chunk sizing: budget minus double-buffered resident W_hh
    rec_budget = max(VMEM_LIMIT - 2 * (2 * H * 4 * H * 2) - (4 << 20), 2 << 20)
    t_chunk = _pick_time_chunk(T, B, H, rec_budget)

    # single time-major bf16 copy of the LM activations
    x_slabs = [jnp.transpose(hidden.astype(jnp.bfloat16), (1, 0, 2)).reshape(N, D)]
    for lp in params["lstm"]:
        gx = fused_matmul(x_slabs, lp["w_ih"], lp["b"],
                          apply_tanh=False, out_dtype=jnp.bfloat16)     # [N, 8H]
        gx = gx.reshape(T, B, 8 * H)                                    # free reshape
        yf, yb = bilstm_layer(gx, lp["w_hh"], H, t_chunk)               # [T,B,H] x2
        x_slabs = [yf.reshape(N, H), yb.reshape(N, H)]                  # free reshapes
    logits_p = fused_matmul(x_slabs, params["clf_w"], params["clf_b"],
                            apply_tanh=True, out_dtype=jnp.float32)     # [N, Lp]
    logits = logits_p.reshape(T, B, -1)[:, :, :num_labels]
    return jnp.transpose(logits, (1, 0, 2))                             # [B, T, L]


# ----------------------------------------------------------------------------
# Pure-JAX reference (mirrors the kernel math: bf16 matmuls/activations,
# f32 accumulation and f32 h/c state, sigmoid-via-tanh)
# ----------------------------------------------------------------------------
def _mm_bf16(a, w_bf16):
    return jnp.dot(a.astype(jnp.bfloat16), w_bf16,
                   preferred_element_type=jnp.float32)


def _lstm_scan_ref(gx, w_hh, H, reverse):
    # gx: [T, B, 4H] bf16
    T, B, _ = gx.shape
    xs = gx[::-1] if reverse else gx

    def step(carry, gx_t):
        h, c = carry
        gates = gx_t.astype(jnp.float32) + _mm_bf16(h, w_hh)
        i = _sigmoid(gates[:, 0:H])
        f = _sigmoid(gates[:, H:2 * H])
        g = jnp.tanh(gates[:, 2 * H:3 * H])
        o = _sigmoid(gates[:, 3 * H:4 * H])
        c = f * c + i * g
        h = o * jnp.tanh(c)
        return (h, c), h

    init = (jnp.zeros((B, H), jnp.float32), jnp.zeros((B, H), jnp.float32))
    _, ys = lax.scan(step, init, xs)
    ys = ys[::-1] if reverse else ys
    return ys.astype(jnp.bfloat16)


def ner_forward_ref(hidden, params, hidden_dim, num_labels):
    B, T, D = hidden.shape
    H = hidden_dim
    N = T * B
    x_slabs = [jnp.transpose(hidden.astype(jnp.bfloat16), (1, 0, 2)).reshape(N, D)]
    for lp in params["lstm"]:
        acc = jnp.zeros((N, 8 * H), jnp.float32) + lp["b"]
        for k, xk in enumerate(x_slabs):
            acc = acc + _mm_bf16(xk, lp["w_ih"][k])
        gx = acc.astype(jnp.bfloat16).reshape(T, B, 8 * H)
        yf = _lstm_scan_ref(gx[..., :4 * H], lp["w_hh"][0], H, reverse=False)
        yb = _lstm_scan_ref(gx[..., 4 * H:], lp["w_hh"][1], H, reverse=True)
        x_slabs = [yf.reshape(N, H), yb.reshape(N, H)]
    acc = jnp.zeros((N, params["clf_b"].shape[-1]), jnp.float32) + params["clf_b"]
    for k, xk in enumerate(x_slabs):
        xt = jnp.tanh(xk.astype(jnp.float32)).astype(jnp.bfloat16)
        acc = acc + jnp.dot(xt, params["clf_w"][k],
                            preferred_element_type=jnp.float32)
    logits = acc.reshape(T, B, -1)[:, :, :num_labels]
    return jnp.transpose(logits, (1, 0, 2))


# ----------------------------------------------------------------------------
# Deterministic parameter init (mirrors nn.LSTM / nn.Linear shapes & gate order)
# ----------------------------------------------------------------------------
def init_params(key, hidden_dim, num_labels, num_layers=2):
    H = hidden_dim
    Lp = _round_up(num_labels, 128)
    k = 1.0 / np.sqrt(H)
    params = {"lstm": []}
    for layer in range(num_layers):
        k_in = 1 if layer == 0 else 2   # layer>0 consumes fwd+bwd slabs of width H
        w_ih_dirs, w_hh_dirs, b_dirs = [], [], []
        for _ in range(2):              # fwd, bwd
            key, k1, k2, k3, k4 = jax.random.split(key, 5)
            w_ih = jax.random.uniform(k1, (4 * H, k_in * H), jnp.float32, -k, k)
            w_hh = jax.random.uniform(k2, (4 * H, H), jnp.float32, -k, k)
            b_ih = jax.random.uniform(k3, (4 * H,), jnp.float32, -k, k)
            b_hh = jax.random.uniform(k4, (4 * H,), jnp.float32, -k, k)
            w_ih_dirs.append(w_ih.T.reshape(k_in, H, 4 * H))   # input split into slabs
            w_hh_dirs.append(w_hh.T)                            # [H, 4H]
            b_dirs.append(b_ih + b_hh)                          # combined bias [4H]
        params["lstm"].append({
            # fused projection weight: [k_in, H, 8H]  (fwd 4H lanes | bwd 4H lanes)
            "w_ih": jnp.concatenate(w_ih_dirs, axis=-1).astype(jnp.bfloat16),
            "w_hh": jnp.stack(w_hh_dirs).astype(jnp.bfloat16),  # [2, H, 4H]
            "b": jnp.concatenate(b_dirs, axis=-1)[None, :],     # [1, 8H] f32
        })
    key, kc1, kc2 = jax.random.split(key, 3)
    kc = 1.0 / np.sqrt(2 * H)
    w_clf = jax.random.uniform(kc1, (num_labels, 2 * H), jnp.float32, -kc, kc)
    b_clf = jax.random.uniform(kc2, (num_labels,), jnp.float32, -kc, kc)
    w_split = w_clf.T.reshape(2, H, num_labels)                 # [2, H, L]
    w_pad = jnp.zeros((2, H, Lp), jnp.float32).at[:, :, :num_labels].set(w_split)
    b_pad = jnp.zeros((1, Lp), jnp.float32).at[0, :num_labels].set(b_clf)
    params["clf_w"] = w_pad.astype(jnp.bfloat16)                # [2, H, Lp]
    params["clf_b"] = b_pad                                     # [1, Lp] f32
    return params


if __name__ == "__main__":
    B, T, H, NUM_LABELS = 2, 8, 32, 2

    key = jax.random.PRNGKey(0)
    key, kp, kx = jax.random.split(key, 3)
    params = init_params(kp, H, NUM_LABELS)
    # LM hidden states stand-in (the external self.lm output[0])
    hidden = jax.random.normal(kx, (B, T, H), jnp.float32)

    out = jax.block_until_ready(ner_forward(hidden, params, H, NUM_LABELS))
    ref = jax.block_until_ready(ner_forward_ref(hidden, params, H, NUM_LABELS))

    np.testing.assert_allclose(np.asarray(out), np.asarray(ref),
                               rtol=2e-2, atol=2e-2)
    assert out.shape == (B, T, NUM_LABELS)
    print("KERNEL_OK")
</pallas_src>

<mosaic_0001>
module attributes {stable_mosaic.version = 11 : i64} {
  func.func @_fused_mm_kernel(%arg0: i32, %arg1: memref<16x32xbf16, #tpu.memory_space<vmem>>, %arg2: memref<1x32x256xbf16, #tpu.memory_space<vmem>>, %arg3: memref<1x256xf32, #tpu.memory_space<vmem>>, %arg4: memref<16x256xbf16, #tpu.memory_space<vmem>>) attributes {dimension_semantics = [#tpu.dimension_semantics<parallel>], iteration_bounds = array<i64: 1>, scalar_prefetch = 0 : i64, scratch_operands = 0 : i64, tpu.core_type = #tpu.core_type<tc>, window_params = [{transform_indices = @transform_0, window_bounds = array<i64: 16, 32>}, {pipeline_mode = #tpu.pipeline_mode<synchronous>, transform_indices = @transform_1, window_bounds = array<i64: 1, 32, 256>}, {pipeline_mode = #tpu.pipeline_mode<synchronous>, transform_indices = @transform_2, window_bounds = array<i64: 1, 256>}, {transform_indices = @transform_3, window_bounds = array<i64: 16, 256>}]} {
    %cst = arith.constant 0.000000e+00 : f32
    %0 = vector.broadcast %cst : f32 to vector<16x256xf32>
    %c0 = arith.constant 0 : index
    %c0_0 = arith.constant 0 : index
    %1 = vector.load %arg3[%c0, %c0_0] : memref<1x256xf32, #tpu.memory_space<vmem>>, vector<1x256xf32>
    %2 = vector.broadcast %1 : vector<1x256xf32> to vector<16x256xf32>
    %3 = arith.addf %0, %2 : vector<16x256xf32>
    %c0_1 = arith.constant 0 : index
    %c0_2 = arith.constant 0 : index
    %4 = vector.load %arg1[%c0_1, %c0_2] : memref<16x32xbf16, #tpu.memory_space<vmem>>, vector<16x32xbf16>
    %c0_3 = arith.constant 0 : index
    %c0_4 = arith.constant 0 : index
    %c0_5 = arith.constant 0 : index
    %5 = vector.load %arg2[%c0_3, %c0_4, %c0_5] : memref<1x32x256xbf16, #tpu.memory_space<vmem>>, vector<1x32x256xbf16>
    %6 = vector.shape_cast %5 : vector<1x32x256xbf16> to vector<32x256xbf16>
    %cst_6 = arith.constant dense<0.000000e+00> : vector<16x256xf32>
    %7 = tpu.matmul %4, %6, %cst_6 {dimension_numbers = #tpu.dot_dimension_numbers<[1], [0], [0], [1], [0, 0, 1, 1], [], []>} : vector<16x32xbf16>, vector<32x256xbf16>, vector<16x256xf32> -> vector<16x256xf32>
    %8 = arith.addf %3, %7 : vector<16x256xf32>
    %9 = arith.truncf %8 : vector<16x256xf32> to vector<16x256xbf16>
    %c0_7 = arith.constant 0 : index
    %c0_8 = arith.constant 0 : index
    %10 = vector.load %arg4[%c0_7, %c0_8] : memref<16x256xbf16, #tpu.memory_space<vmem>>, vector<16x256xbf16>
    tpu.vector_store %arg4[%c0_7, %c0_8], %9 {strides = array<i32>} : memref<16x256xbf16, #tpu.memory_space<vmem>>, vector<16x256xbf16>,
    return
  }
  func.func @transform_0(%arg0: i32) -> (i32, i32) {
    %c0_i32 = arith.constant 0 : i32
    %c0_i32_0 = arith.constant 0 : i32
    return %arg0, %c0_i32 : i32, i32
  }
  func.func @transform_1(%arg0: i32) -> (i32, i32, i32) {
    %c0_i32 = arith.constant 0 : i32
    %c0_i32_0 = arith.constant 0 : i32
    %c0_i32_1 = arith.constant 0 : i32
    %c0_i32_2 = arith.constant 0 : i32
    return %c0_i32, %c0_i32_0, %c0_i32_1 : i32, i32, i32
  }
  func.func @transform_2(%arg0: i32) -> (i32, i32) {
    %c0_i32 = arith.constant 0 : i32
    %c0_i32_0 = arith.constant 0 : i32
    %c0_i32_1 = arith.constant 0 : i32
    return %c0_i32, %c0_i32_0 : i32, i32
  }
  func.func @transform_3(%arg0: i32) -> (i32, i32) {
    %c0_i32 = arith.constant 0 : i32
    %c0_i32_0 = arith.constant 0 : i32
    return %arg0, %c0_i32 : i32, i32
  }
}

</mosaic_0001>

<bundles_post_ra>
// kernel: tpu_custom_call.1
= control target key start
LH: loop header
LB: loop body
LE: loop exit
PB: predicated region body
PF: predicated region fallthrough
CT: control target
= control target key end

     0   :  { %8 = vsyncpa [#allocation3], 0  ;;  %s309_s0 = inlined_call_operand.hbm [shape: bf16[16,32], index: 0, kind: input, shape index: {}]   ;;  %s310_s1 = inlined_call_operand.hbm [shape: bf16[1,32,256], index: 1, kind: input, shape index: {}]   ;;  %s311_s2 = inlined_call_operand.vmem [shape: f32[1,256], index: 2, kind: input, shape index: {}]   ;;  %s312_s3 = inlined_call_operand.hbm [shape: bf16[16,256], index: 3, kind: output, shape index: {}]  }
   0x1   :  { %9 = vsyncpa [#allocation6], 0 }
   0x2   :  { %10 = vsyncpa [#allocation4], 0  ;;  %s263_s12 = smov [#allocation2]  }
   0x3   :  { %s16_s13 = sshll.u32 %s263_s12, 4  ;;  %s17_s13 = int_to_ptr.vmem [resolvable:$true] %s16_s13 }
   0x4   :  { %s205_s14 = scalar_lea.vmem %s17_s13, 128  ;;  %p210_p1 = scmp.lt.s32.totalorder %s17_s13, %s17_s13 }
   0x5   :  { %p206_p0 = scmp.ne.s32.totalorder %s17_s13, %s205_s14  ;;  %p211_p2 = scmp.lt.s32.totalorder %s205_s14, %s205_s14 }
   0x7   :  { %p212_p3 = por %p211_p2, %p210_p1 }
   0x9   :  { %p213_p4 = pnand %p212_p3, %p206_p0 }
   0xb   :  { %216 = shalt.err (!%p213_p4)
}
   0xc   :  { %s264_s15 = smov 64   ;;  %s265_s16 = smov 4  }
   0xd   :  { %22 = dma.hbm_to_vmem [thread:$0]  %s309_s0, 128, %s17_s13, [#allocation3], %s264_s15, %s264_s15, %s265_s16  }
   0xe   :  { %s266_s19 = smov [#allocation5]  }
   0xf   :  { %s28_s20 = sshll.u32 %s266_s19, 4  ;;  %s29_s20 = int_to_ptr.vmem [resolvable:$true] %s28_s20 }
  0x10   :  { %s225_s21 = scalar_lea.vmem %s29_s20, 512  ;;  %p230_p6 = scmp.lt.s32.totalorder %s29_s20, %s29_s20 }
  0x11   :  { %p226_p5 = scmp.ne.s32.totalorder %s29_s20, %s225_s21  ;;  %p231_p7 = scmp.lt.s32.totalorder %s225_s21, %s225_s21 }
  0x13   :  { %p232_p8 = por %p231_p7, %p230_p6 }
  0x15   :  { %p233_p9 = pnand %p232_p8, %p226_p5 }
  0x17   :  { %236 = shalt.err (!%p233_p9)
}
  0x18   :  { %s267_s22 = smov 128   ;;  %s268_s23 = smov 8  }
  0x19   :  { %34 = dma.hbm_to_vmem [thread:$0]  %s310_s1, 512, %s29_s20, [#allocation6], %s267_s22, %s267_s22, %s268_s23  }
  0x1a   :  { %257 = dma.done.wait [#allocation3], 128  }
  0x1b   :  { %258 = vsyncadd [#allocation3], 4294967168 }
  0x1c   :  { %259 = dma.done.wait [#allocation6], 512  }
  0x1d   :  { %260 = vsyncadd [#allocation6], 4294966784  ;;  %v269_v0 = vmov 0   ;;  %v190_v1 = vld [vmem:[#allocation5 + $0x14] ss:$8 sps:$4 sm:$0xff]   ;;  %vm89_vm0 = vcmask 261120   ;;  %v46_v6 = vlaneseq }
  0x1e   :  { %125 = vmatprep.mubr.bf16.mxu0 %v269_v0  ;;  %v192_v2 = vld [vmem:[#allocation5 + $0x10] ss:$8 sps:$4 sm:$0xff]   ;;  %105 = vmatprep.subr.bf16.mxu0 %v190_v1  ;;  %v193_v3 = vld [vmem:[#allocation5 + $0x4] ss:$8 sps:$4 sm:$0xff]   ;;  %v195_v4 = vld [vmem:[#allocation5] ss:$8 sps:$4 sm:$0xff]  }
  0x1f   :  { %106 = vmatpush1.bf16.msra.mxu0 %v192_v2  ;;  %v196_v5 = vld [vmem:[#allocation2] sm:$0xff]   ;;  %v47_v7 = vshrl.u32 %v46_v6, 7  ;;  %s270_s26 = smov [#allocation7]  }
  0x20   :  { %107 = vmatprep.subr.bf16.mxu0 %v193_v3  ;;  %v44_v10 = vld [vmem:[%s311_s2] sm:$0x3]  ;;  %s159_s27 = sshll.u32 %s270_s26, 4  ;;  %s160_s27 = int_to_ptr.vmem [resolvable:$true] %s159_s27 }
  0x21   :  { %v48_v8 = vsub.s32 0, %v47_v7  ;;  %v52_v9 = vsub.s32 1, %v47_v7  ;;  %s237_s28 = scalar_lea.vmem %s160_s27, 256  ;;  %p242_p11 = scmp.lt.s32.totalorder %s160_s27, %s160_s27 }
  0x22   :  { %p238_p10 = scmp.ne.s32.totalorder %s160_s27, %s237_s28  ;;  %p243_p12 = scmp.lt.s32.totalorder %s237_s28, %s237_s28 }
  0x23   :  { %108 = vmatpush1.bf16.msra.mxu0 %v195_v4  ;;  %v49_v11 = vrot.slane %v44_v10, %v48_v8  ;;  %v53_v12 = vrot.slane %v44_v10, %v52_v9 }
  0x24   :  { %p244_p13 = por %p243_p12, %p242_p11 }
  0x26   :  { %177 = vmatmul.mubr.msk.bf16.vlgmr.msra.gmra.mxu0 %vm89_vm0, %v196_v5  ;;  %p245_p0 = pnand %p244_p13, %p238_p10 }
  0xe6   :  { %v127_v13 = vpop.f32.mrf.mxu0 }
  0xe7   :  { %v136_v15 = vadd.f32 %v127_v13, %v49_v11 }
  0xe8   :  { %v129_v14 = vpop.f32.mrf.mxu0 }
  0xe9   :  { %v137_v16 = vadd.f32 %v129_v14, %v53_v12 }
  0xea   :  { %v131_v17 = vpop.f32.mrf.mxu0 }
  0xeb   :  { %v180_v18 = vpack.c.bf16 %v137_v16, %v136_v15  ;;  %v138_v20 = vadd.f32 %v131_v17, %v49_v11 }
  0xec   :  { %v133_v19 = vpop.f32.mrf.mxu0 }
  0xed   :  { %152 = vst [vmem:[#allocation7] sm:$0xff] %v180_v18  ;;  %v139_v21 = vadd.f32 %v133_v19, %v53_v12 }
  0xef   :  { %v181_v22 = vpack.c.bf16 %v139_v21, %v138_v20 }
  0xf1   :  { %153 = vst [vmem:[#allocation7 + $0x8] sm:$0xff] %v181_v22 }
  0xf2   :  { %248 = shalt.err (!%p245_p0)
}
  0xf3   :  { %165 = dma.vmem_to_hbm [thread:$0]  %s160_s27, 256, %s312_s3, [#allocation4], %s267_s22, %s267_s22, %s268_s23  }
  0xf4   :  { %261 = dma.done.wait [#allocation4], 256  }
  0xf5   :  { %262 = vsyncadd [#allocation4], 4294967040 }
  0xf6   :  { %169 = vsyncpa [#allocation3], 1 }
  0xf7   :  { %170 = vsyncpa [#allocation6], 1 }
  0xf8   :  { %171 = vsyncpa [#allocation4], 1 }

</bundles_post_ra>
